<compile_context>
chip_gen: v6e
topology: v6e:2x2x1
jax: 0.10.0
libtpu: 0.0.40
codegen_flags: <defaults>
</compile_context>

<pallas_src>
import jax
import jax.numpy as jnp
from jax.experimental import pallas as pl
from jax.experimental.pallas import tpu as pltpu


def _round_up(x: int, m: int) -> int:
    return ((x + m - 1) // m) * m


def _mlp_kernel(x_ref, w1_ref, b1_ref, w2_ref, b2_ref, o_ref):
    # Fused: out = relu(x @ W1 + b1) @ W2 + b2
    # x/W1/W2 are bf16 (MXU-native); accumulation and biases stay f32.
    h = jnp.dot(x_ref[...], w1_ref[...], preferred_element_type=jnp.float32)
    h = jnp.maximum(h + b1_ref[...], 0.0)                      # [TB, H] f32
    o = jnp.dot(h.astype(jnp.bfloat16), w2_ref[...],
                preferred_element_type=jnp.float32)
    o_ref[...] = (o + b2_ref[...]).astype(o_ref.dtype)         # [TB, F_out_p]


def init_params(key, input_size, output_size, n_channels, hidden=512,
                dtype=jnp.float32):
    """Deterministic init mirroring torch.nn.Linear default (U(-1/sqrt(fan_in), +)).

    Weights are stored transposed vs. torch (W: [in, out]) so the hot path is
    two plain row-major MXU matmuls.
    """
    f_in = n_channels * input_size
    f_out = n_channels * output_size
    k1, k2, k3, k4 = jax.random.split(key, 4)
    bound1 = 1.0 / (f_in ** 0.5)
    bound2 = 1.0 / (hidden ** 0.5)
    w1 = jax.random.uniform(k1, (f_in, hidden), dtype, -bound1, bound1)
    b1 = jax.random.uniform(k2, (1, hidden), dtype, -bound1, bound1)
    w2 = jax.random.uniform(k3, (hidden, f_out), dtype, -bound2, bound2)
    b2 = jax.random.uniform(k4, (1, f_out), dtype, -bound2, bound2)
    return w1, b1, w2, b2


def pack_params(w1, b1, w2, b2):
    """One-time packing: pad feature dims to multiples of 128, cast weights to bf16.

    Zero-padded W1 rows pair with zero-padded x columns (contribute 0); padded
    W2 columns produce extra output columns that are sliced off after the call,
    so forward semantics are unchanged.
    """
    f_in, hidden = w1.shape
    f_out = w2.shape[1]
    assert hidden % 128 == 0, "hidden width must be a multiple of 128"
    f_in_p = _round_up(f_in, 128)
    f_out_p = _round_up(f_out, 128)
    w1p = jnp.pad(w1, ((0, f_in_p - f_in), (0, 0))).astype(jnp.bfloat16)
    w2p = jnp.pad(w2, ((0, 0), (0, f_out_p - f_out))).astype(jnp.bfloat16)
    b1p = b1.astype(jnp.float32)
    b2p = jnp.pad(b2, ((0, 0), (0, f_out_p - f_out))).astype(jnp.float32)
    return w1p, b1p, w2p, b2p


def mlp_forward(x, w1p, b1p, w2p, b2p, out_features=None):
    """x: [B, F_in] (f32 or bf16); packed params from pack_params().

    Returns [B, out_features] in float32.
    """
    B, f_in = x.shape
    f_in_p, hidden = w1p.shape
    f_out_p = w2p.shape[1]
    if out_features is None:
        out_features = f_out_p

    # Batch tile: up to 512 rows per grid step (amortizes per-step overhead,
    # lets x/out DMA double-buffer, and keeps VMEM footprint tiny — well under
    # v7x's 64 MiB). Pad batch so it divides evenly.
    tb = min(512, _round_up(B, 8))
    b_p = _round_up(B, tb)
    x_p = jnp.pad(x.astype(jnp.bfloat16),
                  ((0, b_p - B), (0, f_in_p - f_in)))

    grid = (b_p // tb,)

    cost = pl.CostEstimate(
        flops=2 * b_p * (f_in_p * hidden + hidden * f_out_p),
        transcendentals=0,
        bytes_accessed=(x_p.size * 2 + w1p.size * 2 + w2p.size * 2
                        + b1p.size * 4 + b2p.size * 4 + b_p * f_out_p * 4),
    )

    out = pl.pallas_call(
        _mlp_kernel,
        out_shape=jax.ShapeDtypeStruct((b_p, f_out_p), jnp.float32),
        grid_spec=pltpu.PrefetchScalarGridSpec(
            num_scalar_prefetch=0,
            grid=grid,
            in_specs=[
                # x: one batch tile per grid step.
                pl.BlockSpec((tb, f_in_p), lambda i: (i, 0)),
                # Weights / biases: same block every step -> DMA'd once,
                # VMEM-resident across the whole batch loop.
                pl.BlockSpec((f_in_p, hidden), lambda i: (0, 0)),
                pl.BlockSpec((1, hidden), lambda i: (0, 0)),
                pl.BlockSpec((hidden, f_out_p), lambda i: (0, 0)),
                pl.BlockSpec((1, f_out_p), lambda i: (0, 0)),
            ],
            out_specs=pl.BlockSpec((tb, f_out_p), lambda i: (i, 0)),
        ),
        compiler_params=pltpu.CompilerParams(
            dimension_semantics=("parallel",),      # batch tiles split across TCs (v7x)
            vmem_limit_bytes=32 * 1024 * 1024,
        ),
        cost_estimate=cost,
    )(x_p, w1p, b1p, w2p, b2p)

    return out[:B, :out_features]


if __name__ == "__main__":
    # Small shapes consistent with the module:
    #   n_channels=4, input_size=16 -> F_in = 64; output_size=8 -> F_out = 32
    batch = 2
    input_size = 16
    output_size = 8
    n_channels = 4
    f_out = n_channels * output_size

    key = jax.random.PRNGKey(0)
    kx, kp = jax.random.split(key)

    # Input already flattened over channels*time, as in forward().
    x = jax.random.normal(kx, (batch, n_channels * input_size), jnp.float32)
    w1, b1, w2, b2 = init_params(kp, input_size, output_size, n_channels)

    # One-time weight packing (bf16 + lane-dense padding).
    w1p, b1p, w2p, b2p = pack_params(w1, b1, w2, b2)

    # TODO(synk): at B=2 this call is weight-DMA/launch bound; real wins need a
    # larger effective batch or VMEM-persistent weights across calls (P10).
    out = mlp_forward(x, w1p, b1p, w2p, b2p, out_features=f_out)
    out = jax.block_until_ready(out)
    assert out.shape == (batch, f_out)

    # Reference 1: same bf16 compute path in pure JAX (tight tolerance).
    h_bf = jnp.maximum(
        jnp.dot(x.astype(jnp.bfloat16), w1.astype(jnp.bfloat16),
                preferred_element_type=jnp.float32) + b1, 0.0)
    ref_bf = jnp.dot(h_bf.astype(jnp.bfloat16), w2.astype(jnp.bfloat16),
                     preferred_element_type=jnp.float32) + b2
    assert jnp.allclose(out, ref_bf, atol=2e-3, rtol=2e-3)

    # Reference 2: full f32 torch-equivalent semantics (looser tolerance for
    # bf16 weight/activation quantization).
    ref_f32 = jnp.maximum(x @ w1 + b1, 0.0) @ w2 + b2
    assert jnp.allclose(out, ref_f32, atol=3e-2, rtol=3e-2)

    print("KERNEL_OK")
</pallas_src>

<mosaic_0001>
module attributes {stable_mosaic.version = 11 : i64} {
  func.func @_mlp_kernel(%arg0: i32, %arg1: memref<8x128xbf16, #tpu.memory_space<vmem>>, %arg2: memref<128x512xbf16, #tpu.memory_space<vmem>>, %arg3: memref<1x512xf32, #tpu.memory_space<vmem>>, %arg4: memref<512x128xbf16, #tpu.memory_space<vmem>>, %arg5: memref<1x128xf32, #tpu.memory_space<vmem>>, %arg6: memref<8x128xf32, #tpu.memory_space<vmem>>) attributes {dimension_semantics = [#tpu.dimension_semantics<parallel>], iteration_bounds = array<i64: 1>, scalar_prefetch = 0 : i64, scratch_operands = 0 : i64, tpu.core_type = #tpu.core_type<tc>, window_params = [{transform_indices = @transform_0, window_bounds = array<i64: 8, 128>}, {pipeline_mode = #tpu.pipeline_mode<synchronous>, transform_indices = @transform_1, window_bounds = array<i64: 128, 512>}, {pipeline_mode = #tpu.pipeline_mode<synchronous>, transform_indices = @transform_2, window_bounds = array<i64: 1, 512>}, {pipeline_mode = #tpu.pipeline_mode<synchronous>, transform_indices = @transform_3, window_bounds = array<i64: 512, 128>}, {pipeline_mode = #tpu.pipeline_mode<synchronous>, transform_indices = @transform_4, window_bounds = array<i64: 1, 128>}, {transform_indices = @transform_5, window_bounds = array<i64: 8, 128>}]} {
    %c0 = arith.constant 0 : index
    %c0_0 = arith.constant 0 : index
    %0 = vector.load %arg1[%c0, %c0_0] : memref<8x128xbf16, #tpu.memory_space<vmem>>, vector<8x128xbf16>
    %c0_1 = arith.constant 0 : index
    %c0_2 = arith.constant 0 : index
    %1 = vector.load %arg2[%c0_1, %c0_2] : memref<128x512xbf16, #tpu.memory_space<vmem>>, vector<128x512xbf16>
    %cst = arith.constant dense<0.000000e+00> : vector<8x512xf32>
    %2 = tpu.matmul %0, %1, %cst {dimension_numbers = #tpu.dot_dimension_numbers<[1], [0], [0], [1], [0, 0, 1, 1], [], []>} : vector<8x128xbf16>, vector<128x512xbf16>, vector<8x512xf32> -> vector<8x512xf32>
    %c0_3 = arith.constant 0 : index
    %c0_4 = arith.constant 0 : index
    %3 = vector.load %arg3[%c0_3, %c0_4] : memref<1x512xf32, #tpu.memory_space<vmem>>, vector<1x512xf32>
    %4 = vector.broadcast %3 : vector<1x512xf32> to vector<8x512xf32>
    %5 = arith.addf %2, %4 : vector<8x512xf32>
    %cst_5 = arith.constant 0.000000e+00 : f32
    %6 = vector.broadcast %cst_5 : f32 to vector<8x512xf32>
    %7 = arith.maximumf %5, %6 : vector<8x512xf32>
    %8 = arith.truncf %7 : vector<8x512xf32> to vector<8x512xbf16>
    %c0_6 = arith.constant 0 : index
    %c0_7 = arith.constant 0 : index
    %9 = vector.load %arg4[%c0_6, %c0_7] : memref<512x128xbf16, #tpu.memory_space<vmem>>, vector<512x128xbf16>
    %cst_8 = arith.constant dense<0.000000e+00> : vector<8x128xf32>
    %10 = tpu.matmul %8, %9, %cst_8 {dimension_numbers = #tpu.dot_dimension_numbers<[1], [0], [0], [1], [0, 0, 1, 1], [], []>} : vector<8x512xbf16>, vector<512x128xbf16>, vector<8x128xf32> -> vector<8x128xf32>
    %c0_9 = arith.constant 0 : index
    %c0_10 = arith.constant 0 : index
    %11 = vector.load %arg5[%c0_9, %c0_10] : memref<1x128xf32, #tpu.memory_space<vmem>>, vector<1x128xf32>
    %12 = vector.broadcast %11 : vector<1x128xf32> to vector<8x128xf32>
    %13 = arith.addf %10, %12 : vector<8x128xf32>
    %c0_11 = arith.constant 0 : index
    %c0_12 = arith.constant 0 : index
    %14 = vector.load %arg6[%c0_11, %c0_12] : memref<8x128xf32, #tpu.memory_space<vmem>>, vector<8x128xf32>
    tpu.vector_store %arg6[%c0_11, %c0_12], %13 {strides = array<i32>} : memref<8x128xf32, #tpu.memory_space<vmem>>, vector<8x128xf32>,
    return
  }
  func.func @transform_0(%arg0: i32) -> (i32, i32) {
    %c0_i32 = arith.constant 0 : i32
    %c0_i32_0 = arith.constant 0 : i32
    return %arg0, %c0_i32 : i32, i32
  }
  func.func @transform_1(%arg0: i32) -> (i32, i32) {
    %c0_i32 = arith.constant 0 : i32
    %c0_i32_0 = arith.constant 0 : i32
    %c0_i32_1 = arith.constant 0 : i32
    return %c0_i32, %c0_i32_0 : i32, i32
  }
  func.func @transform_2(%arg0: i32) -> (i32, i32) {
    %c0_i32 = arith.constant 0 : i32
    %c0_i32_0 = arith.constant 0 : i32
    %c0_i32_1 = arith.constant 0 : i32
    return %c0_i32, %c0_i32_0 : i32, i32
  }
  func.func @transform_3(%arg0: i32) -> (i32, i32) {
    %c0_i32 = arith.constant 0 : i32
    %c0_i32_0 = arith.constant 0 : i32
    %c0_i32_1 = arith.constant 0 : i32
    return %c0_i32, %c0_i32_0 : i32, i32
  }
  func.func @transform_4(%arg0: i32) -> (i32, i32) {
    %c0_i32 = arith.constant 0 : i32
    %c0_i32_0 = arith.constant 0 : i32
    %c0_i32_1 = arith.constant 0 : i32
    return %c0_i32, %c0_i32_0 : i32, i32
  }
  func.func @transform_5(%arg0: i32) -> (i32, i32) {
    %c0_i32 = arith.constant 0 : i32
    %c0_i32_0 = arith.constant 0 : i32
    return %arg0, %c0_i32 : i32, i32
  }
}

</mosaic_0001>

<bundles_post_ra>
// kernel: tpu_custom_call.1
= control target key start
LH: loop header
LB: loop body
LE: loop exit
PB: predicated region body
PF: predicated region fallthrough
CT: control target
= control target key end

     0   :  { %10 = vsyncpa [#allocation3], 0  ;;  %s1104_s0 = inlined_call_operand.hbm [shape: bf16[8,128], index: 0, kind: input, shape index: {}]   ;;  %s1105_s1 = inlined_call_operand.hbm [shape: bf16[128,512], index: 1, kind: input, shape index: {}]   ;;  %s1106_s2 = inlined_call_operand.hbm [shape: f32[1,512], index: 2, kind: input, shape index: {}]   ;;  %s1107_s3 = inlined_call_operand.hbm [shape: bf16[512,128], index: 3, kind: input, shape index: {}]   ;;  %s1108_s4 = inlined_call_operand.vmem [shape: f32[1,128], index: 4, kind: input, shape index: {}]   ;;  %s1109_s5 = inlined_call_operand.hbm [shape: f32[8,128], index: 5, kind: output, shape index: {}]  }
   0x1   :  { %11 = vsyncpa [#allocation6], 0 }
   0x2   :  { %12 = vsyncpa [#allocation9], 0 }
   0x3   :  { %13 = vsyncpa [#allocation4], 0  ;;  %s1046_s18 = smov [#allocation5]  }
   0x4   :  { %s29_s19 = sshll.u32 %s1046_s18, 4  ;;  %s30_s19 = int_to_ptr.vmem [resolvable:$true] %s29_s19 }
   0x5   :  { %s946_s20 = scalar_lea.vmem %s30_s19, 4096  ;;  %p951_p1 = scmp.lt.s32.totalorder %s30_s19, %s30_s19 }
   0x6   :  { %p947_p0 = scmp.ne.s32.totalorder %s30_s19, %s946_s20  ;;  %p952_p2 = scmp.lt.s32.totalorder %s946_s20, %s946_s20 }
   0x8   :  { %p953_p3 = por %p952_p2, %p951_p1 }
   0xa   :  { %p954_p4 = pnand %p953_p3, %p947_p0 }
   0xc   :  { %957 = shalt.err (!%p954_p4)
}
   0xd   :  { %s1047_s21 = smov 256   ;;  %s1048_s22 = smov 16  }
   0xe   :  { %35 = dma.hbm_to_vmem [thread:$0]  %s1105_s1, 4096, %s30_s19, [#allocation6], %s1047_s21, %s1047_s21, %s1048_s22  }
   0xf   :  { %s1049_s25 = smov [#allocation2]   ;;  %s1050_s27 = smov [#allocation7]  }
  0x10   :  { %s20_s26 = sshll.u32 %s1049_s25, 4  ;;  %s42_s28 = sshll.u32 %s1050_s27, 4  ;;  %s21_s26 = int_to_ptr.vmem [resolvable:$true] %s20_s26  ;;  %s43_s28 = int_to_ptr.vmem [resolvable:$true] %s42_s28 }
  0x11   :  { %s966_s29 = scalar_lea.vmem %s21_s26, 64  ;;  %p971_p6 = scmp.lt.s32.totalorder %s21_s26, %s21_s26 }
  0x12   :  { %p967_p5 = scmp.ne.s32.totalorder %s21_s26, %s966_s29  ;;  %p972_p7 = scmp.lt.s32.totalorder %s966_s29, %s966_s29 }
  0x14   :  { %p973_p8 = por %p972_p7, %p971_p6 }
  0x16   :  { %p974_p9 = pnand %p973_p8, %p967_p5 }
  0x18   :  { %977 = shalt.err (!%p974_p9)
}
  0x19   :  { %23 = dma.hbm_to_vmem [thread:$0]  %s1104_s0, 64, %s21_s26, [#allocation3]  }
  0x1a   :  { %s986_s7 = scalar_lea.vmem %s43_s28, 64  ;;  %p991_p11 = scmp.lt.s32.totalorder %s43_s28, %s43_s28 }
  0x1b   :  { %p987_p10 = scmp.ne.s32.totalorder %s43_s28, %s986_s7  ;;  %p992_p12 = scmp.lt.s32.totalorder %s986_s7, %s986_s7 }
  0x1d   :  { %p993_p13 = por %p992_p12, %p991_p11 }
  0x1f   :  { %p994_p0 = pnand %p993_p13, %p987_p10 }
  0x21   :  { %997 = shalt.err (!%p994_p0)
}
  0x22   :  { %45 = dma.hbm_to_vmem [thread:$0]  %s1106_s2, 64, %s43_s28, [#allocation6]  }
  0x23   :  { %s1051_s9 = smov [#allocation8]  }
  0x24   :  { %s51_s10 = sshll.u32 %s1051_s9, 4  ;;  %s52_s10 = int_to_ptr.vmem [resolvable:$true] %s51_s10 }
  0x25   :  { %s1006_s11 = scalar_lea.vmem %s52_s10, 4096  ;;  %p1011_p2 = scmp.lt.s32.totalorder %s52_s10, %s52_s10 }
  0x26   :  { %p1007_p1 = scmp.ne.s32.totalorder %s52_s10, %s1006_s11  ;;  %p1012_p3 = scmp.lt.s32.totalorder %s1006_s11, %s1006_s11 }
  0x28   :  { %p1013_p4 = por %p1012_p3, %p1011_p2 }
  0x2a   :  { %p1014_p5 = pnand %p1013_p4, %p1007_p1 }
  0x2c   :  { %1017 = shalt.err (!%p1014_p5)
}
  0x2d   :  { %s1052_s0 = smov 64   ;;  %s1053_s12 = smov 4  }
  0x2e   :  { %57 = dma.hbm_to_vmem [thread:$0]  %s1107_s3, 4096, %s52_s10, [#allocation9], %s1052_s0, %s1052_s0, %s1053_s12  }
  0x2f   :  { %1038 = dma.done.wait [#allocation3], 64  }
  0x30   :  { %1039 = vsyncadd [#allocation3], 4294967232 }
  0x31   :  { %1040 = dma.done.wait [#allocation6], 4160  }
  0x32   :  { %1041 = vsyncadd [#allocation6], 4294963136 }
  0x33   :  { %1042 = dma.done.wait [#allocation9], 4096  }
  0x34   :  { %1043 = vsyncadd [#allocation9], 4294963200  ;;  %v1054_v0 = vmov 0   ;;  %v858_v1 = vld [vmem:[#allocation5 + $0xe4] ss:$16 sps:$4 sm:$0xff]   ;;  %v906_v33 = vld [vmem:[#allocation8 + $0x78] sm:$0xff]  }
  0x35   :  { %320 = vmatprep.mubr.bf16.mxu0 %v1054_v0  ;;  %361 = vmatprep.mubr.bf16.mxu1 %v1054_v0  ;;  %v860_v2 = vld [vmem:[#allocation5 + $0xec] ss:$16 sps:$4 sm:$0xff]   ;;  %v862_v3 = vld [vmem:[#allocation5 + $0xe0] ss:$16 sps:$4 sm:$0xff]   ;;  %v863_v4 = vld [vmem:[#allocation5 + $0xe8] ss:$16 sps:$4 sm:$0xff]  }
  0x36   :  { %288 = vmatprep.subr.bf16.mxu0 %v858_v1  ;;  %329 = vmatprep.subr.bf16.mxu1 %v860_v2  ;;  %v864_v5 = vld [vmem:[#allocation5 + $0xc4] ss:$16 sps:$4 sm:$0xff]   ;;  %v866_v6 = vld [vmem:[#allocation5 + $0xcc] ss:$16 sps:$4 sm:$0xff]   ;;  %v868_v7 = vld [vmem:[#allocation5 + $0xc0] ss:$16 sps:$4 sm:$0xff]   ;;  %v108_v2 = vlaneseq }
  0x37   :  { %289 = vmatpush1.bf16.msra.mxu0 %v862_v3  ;;  %330 = vmatpush1.bf16.msra.mxu1 %v863_v4  ;;  %v869_v8 = vld [vmem:[#allocation5 + $0xc8] ss:$16 sps:$4 sm:$0xff]   ;;  %v870_v9 = vld [vmem:[#allocation5 + $0xa4] ss:$16 sps:$4 sm:$0xff]   ;;  %v872_v10 = vld [vmem:[#allocation5 + $0xac] ss:$16 sps:$4 sm:$0xff]  }
  0x38   :  { %290 = vmatprep.subr.bf16.mxu0 %v864_v5  ;;  %331 = vmatprep.subr.bf16.mxu1 %v866_v6  ;;  %v874_v11 = vld [vmem:[#allocation5 + $0xa0] ss:$16 sps:$4 sm:$0xff]   ;;  %v875_v12 = vld [vmem:[#allocation5 + $0xa8] ss:$16 sps:$4 sm:$0xff]   ;;  %v876_v13 = vld [vmem:[#allocation5 + $0x84] ss:$16 sps:$4 sm:$0xff]  }
  0x39   :  { %v878_v14 = vld [vmem:[#allocation5 + $0x8c] ss:$16 sps:$4 sm:$0xff]   ;;  %v880_v15 = vld [vmem:[#allocation5 + $0x80] ss:$16 sps:$4 sm:$0xff]   ;;  %v881_v16 = vld [vmem:[#allocation5 + $0x88] ss:$16 sps:$4 sm:$0xff]  }
  0x3a   :  { %v882_v17 = vld [vmem:[#allocation5 + $0x64] ss:$16 sps:$4 sm:$0xff]   ;;  %v884_v18 = vld [vmem:[#allocation5 + $0x6c] ss:$16 sps:$4 sm:$0xff]   ;;  %v886_v19 = vld [vmem:[#allocation5 + $0x60] ss:$16 sps:$4 sm:$0xff]  }
  0x3b   :  { %291 = vmatpush1.bf16.msra.mxu0 %v868_v7  ;;  %332 = vmatpush1.bf16.msra.mxu1 %v869_v8  ;;  %v887_v20 = vld [vmem:[#allocation5 + $0x68] ss:$16 sps:$4 sm:$0xff]   ;;  %v888_v21 = vld [vmem:[#allocation5 + $0x44] ss:$16 sps:$4 sm:$0xff]   ;;  %v890_v22 = vld [vmem:[#allocation5 + $0x4c] ss:$16 sps:$4 sm:$0xff]  }
  0x3c   :  { %292 = vmatprep.subr.bf16.mxu0 %v870_v9  ;;  %333 = vmatprep.subr.bf16.mxu1 %v872_v10  ;;  %v892_v23 = vld [vmem:[#allocation5 + $0x40] ss:$16 sps:$4 sm:$0xff]   ;;  %v893_v24 = vld [vmem:[#allocation5 + $0x48] ss:$16 sps:$4 sm:$0xff]   ;;  %v894_v25 = vld [vmem:[#allocation5 + $0x24] ss:$16 sps:$4 sm:$0xff]  }
  0x3d   :  { %v896_v26 = vld [vmem:[#allocation5 + $0x2c] ss:$16 sps:$4 sm:$0xff]   ;;  %v898_v27 = vld [vmem:[#allocation5 + $0x20] ss:$16 sps:$4 sm:$0xff]   ;;  %v899_v28 = vld [vmem:[#allocation5 + $0x28] ss:$16 sps:$4 sm:$0xff]  }
  0x3e   :  { %v900_v29 = vld [vmem:[#allocation5 + $0x4] ss:$16 sps:$4 sm:$0xff]   ;;  %v902_v30 = vld [vmem:[#allocation5 + $0xc] ss:$16 sps:$4 sm:$0xff]   ;;  %v904_v31 = vld [vmem:[#allocation5] ss:$16 sps:$4 sm:$0xff]  }
  0x3f   :  { %293 = vmatpush1.bf16.msra.mxu0 %v874_v11  ;;  %334 = vmatpush1.bf16.msra.mxu1 %v875_v12  ;;  %v905_v32 = vld [vmem:[#allocation5 + $0x8] ss:$16 sps:$4 sm:$0xff]   ;;  %v907_v34 = vld [vmem:[#allocation8 + $0xf8] sm:$0xff]   ;;  %v914_v42 = vld [vmem:[#allocation8 + $0x68] sm:$0xff]   ;;  %v109_v3 = vshrl.u32 %v108_v2, 7  ;;  %s1055_s15 = smov [#allocation10]  }
  0x40   :  { %294 = vmatprep.subr.bf16.mxu0 %v876_v13  ;;  %335 = vmatprep.subr.bf16.mxu1 %v878_v14  ;;  %v73_v35 = vld [vmem:[#allocation2] sm:$0xf]  ;;  %v910_v38 = vld [vmem:[#allocation8 + $0x70] sm:$0xff]   ;;  %v915_v43 = vld [vmem:[#allocation8 + $0xe8] sm:$0xff]   ;;  %s728_s16 = sshll.u32 %s1055_s15, 4  ;;  %s729_s16 = int_to_ptr.vmem [resolvable:$true] %s728_s16 }
  0x41   :  { %v908_v36 = vld [vmem:[#allocation8 + $0x38] sm:$0xff]   ;;  %v911_v39 = vld [vmem:[#allocation8 + $0xf0] sm:$0xff]   ;;  %v916_v44 = vld [vmem:[#allocation8 + $0x28] sm:$0xff]   ;;  %v110_v4 = vsub.s32 0, %v109_v3  ;;  %v118_v5 = vsub.s32 2, %v109_v3  ;;  %v114_v7 = vsub.s32 1, %v109_v3  ;;  %p1023_p7 = scmp.lt.s32.totalorder %s729_s16, %s729_s16 }
  0x42   :  { %v909_v37 = vld [vmem:[#allocation8 + $0xb8] sm:$0xff]   ;;  %v912_v40 = vld [vmem:[#allocation8 + $0x30] sm:$0xff]   ;;  %v917_v45 = vld [vmem:[#allocation8 + $0xa8] sm:$0xff]   ;;  %v122_v8 = vsub.s32 3, %v109_v3  ;;  %s1018_s17 = scalar_lea.vmem %s729_s16, 128 }
  0x43   :  { %295 = vmatpush1.bf16.msra.mxu0 %v880_v15  ;;  %336 = vmatpush1.bf16.msra.mxu1 %v881_v16  ;;  %v913_v41 = vld [vmem:[#allocation8 + $0xb0] sm:$0xff]   ;;  %v918_v46 = vld [vmem:[#allocation8 + $0x60] sm:$0xff]   ;;  %v922_v50 = vld [vmem:[#allocation8 + $0x58] sm:$0xff]   ;;  %p1019_p6 = scmp.ne.s32.totalorder %s729_s16, %s1018_s17  ;;  %p1024_p8 = scmp.lt.s32.totalorder %s1018_s17, %s1018_s17 }
  0x44   :  { %296 = vmatprep.subr.bf16.mxu0 %v882_v17  ;;  %337 = vmatprep.subr.bf16.mxu1 %v884_v18  ;;  %v919_v47 = vld [vmem:[#allocation8 + $0xe0] sm:$0xff]   ;;  %v923_v51 = vld [vmem:[#allocation8 + $0xd8] sm:$0xff]   ;;  %v926_v54 = vld [vmem:[#allocation8 + $0x50] sm:$0xff]  }
  0x45   :  { %v920_v48 = vld [vmem:[#allocation8 + $0x20] sm:$0xff]   ;;  %v924_v52 = vld [vmem:[#allocation8 + $0x18] sm:$0xff]   ;;  %v927_v55 = vld [vmem:[#allocation8 + $0xd0] sm:$0xff]   ;;  %p1025_p9 = por %p1024_p8, %p1023_p7 }
  0x46   :  { %v921_v49 = vld [vmem:[#allocation8 + $0xa0] sm:$0xff]   ;;  %v925_v53 = vld [vmem:[#allocation8 + $0x98] sm:$0xff]   ;;  %v928_v56 = vld [vmem:[#allocation8 + $0x10] sm:$0xff]  }
  0x47   :  { %297 = vmatpush1.bf16.msra.mxu0 %v886_v19  ;;  %338 = vmatpush1.bf16.msra.mxu1 %v887_v20  ;;  %v929_v57 = vld [vmem:[#allocation8 + $0x90] sm:$0xff]   ;;  %v930_v58 = vld [vmem:[#allocation8 + $0x48] sm:$0xff]   ;;  %v934_v62 = vld [vmem:[#allocation8 + $0x40] sm:$0xff]   ;;  %p1026_p10 = pnand %p1025_p9, %p1019_p6 }
  0x48   :  { %298 = vmatprep.subr.bf16.mxu0 %v888_v21  ;;  %339 = vmatprep.subr.bf16.mxu1 %v890_v22  ;;  %v931_v59 = vld [vmem:[#allocation8 + $0xc8] sm:$0xff]   ;;  %v935_v63 = vld [vmem:[#allocation8 + $0xc0] sm:$0xff]   ;;  %v106_v6 = vld [vmem:[#allocation7] sm:$0xf] }
  0x49   :  { %v932_v60 = vld [vmem:[#allocation8 + $0x8] sm:$0xff]   ;;  %v936_v0 = vld [vmem:[#allocation8] sm:$0xff]   ;;  %v111_v9 = vrot.slane %v106_v6, %v110_v4  ;;  %v119_v10 = vrot.slane %v106_v6, %v118_v5  ;;  %v115_v11 = vrot.slane %v106_v6, %v114_v7  ;;  %v123_v12 = vrot.slane %v106_v6, %v122_v8 }
  0x4a   :  { %v933_v61 = vld [vmem:[#allocation8 + $0x88] sm:$0xff]   ;;  %v937_v1 = vld [vmem:[#allocation8 + $0x80] sm:$0xff]  }
  0x4b   :  { %299 = vmatpush1.bf16.msra.mxu0 %v892_v23  ;;  %340 = vmatpush1.bf16.msra.mxu1 %v893_v24 }
  0x4c   :  { %300 = vmatprep.subr.bf16.mxu0 %v894_v25  ;;  %341 = vmatprep.subr.bf16.mxu1 %v896_v26 }
  0x4f   :  { %301 = vmatpush1.bf16.msra.mxu0 %v898_v27  ;;  %342 = vmatpush1.bf16.msra.mxu1 %v899_v28 }
  0x50   :  { %302 = vmatprep.subr.bf16.mxu0 %v900_v29  ;;  %343 = vmatprep.subr.bf16.mxu1 %v902_v30 }
  0x53   :  { %303 = vmatpush1.bf16.msra.mxu0 %v904_v31  ;;  %344 = vmatpush1.bf16.msra.mxu1 %v905_v32 }
  0x54   :  { %804 = vmatprep.subr.bf16.mxu0 %v906_v33  ;;  %826 = vmatprep.subr.bf16.mxu1 %v907_v34 }
  0x56   :  { %321 = vmatmul.mubr.bf16.vlgmr.msra.gmra.mxu0 %v73_v35  ;;  %362 = vmatmul.mubr.bf16.vlgmr.msra.gmra.mxu1 %v73_v35  ;;  %v771_v35 = vld [vmem:[%s1108_s4] ss:$0 sm:$0xff] }
  0x57   :  { %805 = vmatpush3.bf16.msra.mxu0 %v908_v36  ;;  %827 = vmatpush3.bf16.msra.mxu1 %v909_v37 }
  0x58   :  { %806 = vmatprep.subr.bf16.mxu0 %v910_v38  ;;  %828 = vmatprep.subr.bf16.mxu1 %v911_v39 }
  0x5b   :  { %807 = vmatpush3.bf16.msra.mxu0 %v912_v40  ;;  %829 = vmatpush3.bf16.msra.mxu1 %v913_v41 }
  0x5c   :  { %808 = vmatprep.subr.bf16.mxu0 %v914_v42  ;;  %830 = vmatprep.subr.bf16.mxu1 %v915_v43 }
  0x5f   :  { %809 = vmatpush3.bf16.msra.mxu0 %v916_v44  ;;  %831 = vmatpush3.bf16.msra.mxu1 %v917_v45 }
  0x60   :  { %810 = vmatprep.subr.bf16.mxu0 %v918_v46  ;;  %832 = vmatprep.subr.bf16.mxu1 %v919_v47 }
  0x63   :  { %811 = vmatpush3.bf16.msra.mxu0 %v920_v48  ;;  %833 = vmatpush3.bf16.msra.mxu1 %v921_v49 }
  0x64   :  { %812 = vmatprep.subr.bf16.mxu0 %v922_v50  ;;  %834 = vmatprep.subr.bf16.mxu1 %v923_v51 }
  0x67   :  { %813 = vmatpush3.bf16.msra.mxu0 %v924_v52  ;;  %835 = vmatpush3.bf16.msra.mxu1 %v925_v53 }
  0x68   :  { %814 = vmatprep.subr.bf16.mxu0 %v926_v54  ;;  %836 = vmatprep.subr.bf16.mxu1 %v927_v55 }
  0x6b   :  { %815 = vmatpush3.bf16.msra.mxu0 %v928_v56  ;;  %837 = vmatpush3.bf16.msra.mxu1 %v929_v57 }
  0x6c   :  { %816 = vmatprep.subr.bf16.mxu0 %v930_v58  ;;  %838 = vmatprep.subr.bf16.mxu1 %v931_v59 }
  0x6f   :  { %817 = vmatpush3.bf16.msra.mxu0 %v932_v60  ;;  %839 = vmatpush3.bf16.msra.mxu1 %v933_v61 }
  0x70   :  { %818 = vmatprep.subr.bf16.mxu0 %v934_v62  ;;  %840 = vmatprep.subr.bf16.mxu1 %v935_v63 }
  0x73   :  { %819 = vmatpush3.bf16.msra.mxu0 %v936_v0  ;;  %841 = vmatpush3.bf16.msra.mxu1 %v937_v1 }
 0x116   :  { %v322_v13 = vpop.f32.mrf.mxu0  ;;  %v363_v14 = vpop.f32.mrf.mxu1 }
 0x117   :  { %v323_v15 = vadd.f32 %v322_v13, %v111_v9  ;;  %v364_v16 = vadd.f32 %v363_v14, %v119_v10 }
 0x118   :  { %v324_v17 = vpop.f32.mrf.mxu0  ;;  %v365_v18 = vpop.f32.mrf.mxu1 }
 0x119   :  { %v372_v19 = vmax.f32 %v364_v16, 0.0  ;;  %v325_v20 = vadd.f32 %v324_v17, %v115_v11  ;;  %v366_v21 = vadd.f32 %v365_v18, %v123_v12  ;;  %v370_v22 = vmax.f32 %v323_v15, 0.0 }
 0x11a   :  { %v326_v23 = vpop.f32.mrf.mxu0  ;;  %v367_v24 = vpop.f32.mrf.mxu1 }
 0x11b   :  { %v371_v25 = vmax.f32 %v325_v20, 0.0  ;;  %v373_v26 = vmax.f32 %v366_v21, 0.0  ;;  %v376_v27 = vpack.c.bf16 %v372_v19, %v372_v19  ;;  %v374_v32 = vpack.c.bf16 %v370_v22, %v370_v22 }
 0x11c   :  { %v327_v28 = vpop.f32.mrf.mxu0  ;;  %v368_v29 = vpop.f32.mrf.mxu1 }
 0x11d   :  { %v375_v30 = vpack.c.bf16 %v371_v25, %v371_v25  ;;  %v377_v31 = vpack.c.bf16 %v373_v26, %v373_v26 }
 0x11f   :  { %673 = vmatprep.mubr.bf16.mxu0 %v375_v30  ;;  %713 = vmatprep.mubr.bf16.mxu1 %v377_v31 }
 0x120   :  { %674 = vmatmul.mubr.bf16.vlgmr.msra.gmra.mxu0 %v374_v32  ;;  %714 = vmatmul.mubr.bf16.vlgmr.msra.gmra.mxu1 %v376_v27 }
 0x1e0   :  { %v820_v33 = vpop.f32.mrf.mxu0  ;;  %v842_v34 = vpop.f32.mrf.mxu1 }
 0x1e2   :  { %v821_v36 = vpop.f32.mrf.mxu0  ;;  %v843_v37 = vpop.f32.mrf.mxu1 }
 0x1e3   :  { %v822_v38 = vadd.f32 %v821_v36, %v820_v33  ;;  %v844_v42 = vadd.f32 %v843_v37, %v842_v34 }
 0x1e4   :  { %v823_v39 = vpop.f32.mrf.mxu0  ;;  %v845_v40 = vpop.f32.mrf.mxu1 }
 0x1e5   :  { %v676_v41 = vadd.f32 %v822_v38, %v771_v35 }
 0x1e6   :  { %v824_v43 = vpop.f32.mrf.mxu0  ;;  %v846_v44 = vpop.f32.mrf.mxu1 }
 0x1e7   :  { %v716_v45 = vadd.f32 %v844_v42, %v676_v41 }
 0x1e9   :  { %721 = vst [vmem:[#allocation10] sm:$0xff] %v716_v45 }
 0x1ea   :  { %1029 = shalt.err (!%p1026_p10)
}
 0x1eb   :  { %731 = dma.vmem_to_hbm [thread:$0]  %s729_s16, 128, %s1109_s5, [#allocation4]  }
 0x1ec   :  { %1044 = dma.done.wait [#allocation4], 128  }
 0x1ed   :  { %1045 = vsyncadd [#allocation4], 4294967168 }
 0x1ee   :  { %735 = vsyncpa [#allocation3], 1 }
 0x1ef   :  { %736 = vsyncpa [#allocation6], 1 }
 0x1f0   :  { %737 = vsyncpa [#allocation9], 1 }
 0x1f1   :  { %738 = vsyncpa [#allocation4], 1 }

</bundles_post_ra>
